<compile_context>
chip_gen: v5e
topology: v5e:2x2
jax: 0.10.0
libtpu: 0.0.40
codegen_flags: <defaults>
</compile_context>

<pallas_src>
import functools

import jax
import jax.numpy as jnp
from jax.experimental import pallas as pl
from jax.experimental.pallas import tpu as pltpu


def mlp_kernel(x_ref, w1_ref, b1_ref, w2_ref, b2_ref,
               w3_ref, b3_ref, w4_ref, b4_ref, out_ref, *, relu_in_bf16):
    # x_ref: (TB, input_size) bf16; weights bf16 (in, out); biases f32 (1, out).
    x = x_ref[...]

    def act(h_f32):
        if relu_in_bf16:
            # v6e/v7x: bf16 VALU -> half the vreg traffic for the activation.
            return jnp.maximum(h_f32.astype(jnp.bfloat16), jnp.bfloat16(0))
        # v5e (no bf16 VALU): ReLU in f32, then cast.
        return jnp.maximum(h_f32, 0.0).astype(jnp.bfloat16)

    # fc1 + ReLU  (dropout1 == identity in eval mode)
    h = jnp.dot(x, w1_ref[...], preferred_element_type=jnp.float32) + b1_ref[...]
    h = act(h)

    # fc2 + ReLU
    h = jnp.dot(h, w2_ref[...], preferred_element_type=jnp.float32) + b2_ref[...]
    h = act(h)

    # fc3 + ReLU  (output dim zero-padded 64 -> 128: lane-dense, K=128 for fc4)
    h = jnp.dot(h, w3_ref[...], preferred_element_type=jnp.float32) + b3_ref[...]
    h = act(h)

    # fc4 (class dim padded to a lane-dense 128; padded bias columns are -1e30)
    logits = jnp.dot(h, w4_ref[...], preferred_element_type=jnp.float32) + b4_ref[...]

    # softmax over the padded class dim (padded cols -> exp(~-inf) == 0 in f32)
    m = jnp.max(logits, axis=-1, keepdims=True)
    e = jnp.exp(logits - m)
    inv = pl.reciprocal(jnp.sum(e, axis=-1, keepdims=True), approx=True)
    out_ref[...] = (e * inv).astype(jnp.bfloat16)


def _round_up(n, m):
    return ((n + m - 1) // m) * m


def _choose_tile(batch, *, cap=1024, split_threshold=256):
    """Adaptive batch tile: multiple of 16 (bf16 sublane pack), <= cap,
    and >=2 tiles for moderate/large batches so v7x can use both TensorCores."""
    n_tiles = max(1, -(-batch // cap))
    if batch >= split_threshold:
        n_tiles = max(n_tiles, 2)
    return _round_up(-(-batch // n_tiles), 16)


def mlp_forward(x_nchw, params):
    """x_nchw: (B, C, H, W).  params: dict of (in, out) weights + (1, out) biases."""
    B = x_nchw.shape[0]
    # nn.Flatten; cast to bf16 BEFORE padding so XLA pads 2-byte elements.
    x2d = x_nchw.reshape(B, -1).astype(jnp.bfloat16)
    input_size = x2d.shape[1]
    num_classes = params["w4"].shape[1]
    hid3 = params["w3"].shape[1]                     # 64

    # --- lane-dense padding of the class dim (10 -> 128) ---
    n_pad = _round_up(max(num_classes, 1), 128)
    # --- pad fc3 output / fc4 input dim 64 -> 128 (zero pad: ReLU(0)=0, 0-rows of w4 add 0)
    h3_pad = _round_up(hid3, 128)

    w3p = jnp.pad(params["w3"], ((0, 0), (0, h3_pad - hid3)))
    b3p = jnp.pad(params["b3"], ((0, 0), (0, h3_pad - hid3)))
    w4p = jnp.pad(params["w4"], ((0, h3_pad - hid3), (0, n_pad - num_classes)))
    b4p = jnp.pad(params["b4"], ((0, 0), (0, n_pad - num_classes)),
                  constant_values=-1e30)             # padded logits -> softmax == 0 (f32)

    # --- bf16 matmul operands (f32 accumulation inside the kernel) ---
    w1 = params["w1"].astype(jnp.bfloat16)
    w2 = params["w2"].astype(jnp.bfloat16)
    w3 = w3p.astype(jnp.bfloat16)
    w4 = w4p.astype(jnp.bfloat16)
    b1 = params["b1"].astype(jnp.float32)
    b2 = params["b2"].astype(jnp.float32)
    b3 = b3p.astype(jnp.float32)
    b4 = b4p.astype(jnp.float32)

    # --- adaptive batch tiling ---
    tb = _choose_tile(B)
    n_tiles = max(1, -(-B // tb))
    B_pad = n_tiles * tb
    x2d = jnp.pad(x2d, ((0, B_pad - B), (0, 0)))

    # bf16 ReLU only where the VALU supports it (v6e / v7x); f32 elsewhere.
    kind = jax.devices()[0].device_kind.lower()
    relu_in_bf16 = ("v6" in kind) or ("v7" in kind) or ("7x" in kind)

    # weights/biases are small: constant block index -> stay resident in VMEM
    resident = lambda arr: pl.BlockSpec(arr.shape, lambda i: (0, 0))

    flops = 2 * B_pad * (input_size * 512 + 512 * 256 + 256 * h3_pad + h3_pad * n_pad)
    bytes_accessed = (
        x2d.size * 2
        + sum(int(a.size) * a.dtype.itemsize for a in (w1, w2, w3, w4, b1, b2, b3, b4))
        + B_pad * n_pad * 2
    )

    out = pl.pallas_call(
        functools.partial(mlp_kernel, relu_in_bf16=relu_in_bf16),
        out_shape=jax.ShapeDtypeStruct((B_pad, n_pad), jnp.bfloat16),
        grid=(n_tiles,),
        in_specs=[
            pl.BlockSpec((tb, input_size), lambda i: (i, 0)),   # x tile, pipelined
            resident(w1), resident(b1),
            resident(w2), resident(b2),
            resident(w3), resident(b3),
            resident(w4), resident(b4),
        ],
        out_specs=pl.BlockSpec((tb, n_pad), lambda i: (i, 0)),
        compiler_params=pltpu.CompilerParams(
            dimension_semantics=("parallel",)),
        cost_estimate=pl.CostEstimate(
            flops=flops,
            transcendentals=B_pad * (n_pad + 1),
            bytes_accessed=bytes_accessed),
    )(x2d, w1, b1, w2, b2, w3, b3, w4, b4)

    return out[:B, :num_classes].astype(jnp.float32)


def init_params(key, input_size, num_classes):
    """Deterministic init. Weights stored already transposed to (in, out) so that
    y = x @ W + b matches PyTorch's y = x @ W_pt.T + b."""
    dims = [(input_size, 512), (512, 256), (256, 64), (64, num_classes)]
    params = {}
    for i, (din, dout) in enumerate(dims, start=1):
        key, kw, kb = jax.random.split(key, 3)
        bound = 1.0 / jnp.sqrt(din)   # PyTorch default Linear init range
        params[f"w{i}"] = jax.random.uniform(kw, (din, dout), jnp.float32, -bound, bound)
        params[f"b{i}"] = jax.random.uniform(kb, (1, dout), jnp.float32, -bound, bound)
    return params


def mlp_ref(x_nchw, params):
    """Pure-JAX f32 reference (PyTorch eval-mode semantics)."""
    x = x_nchw.reshape(x_nchw.shape[0], -1).astype(jnp.float32)
    h = jnp.maximum(x @ params["w1"] + params["b1"], 0.0)
    h = jnp.maximum(h @ params["w2"] + params["b2"], 0.0)
    h = jnp.maximum(h @ params["w3"] + params["b3"], 0.0)
    logits = h @ params["w4"] + params["b4"]
    return jax.nn.softmax(logits, axis=-1)


if __name__ == "__main__":
    # input_shape = (C, H, W) = (1, 16, 16) -> input_size = H*W = 256
    # (C must be 1 for the PyTorch module's fc1 to be consistent with Flatten).
    B, C, H, W = 2, 1, 16, 16
    num_classes = 10
    input_size = H * W

    key = jax.random.PRNGKey(0)
    key, kx = jax.random.split(key)
    x = jax.random.normal(kx, (B, C, H, W), jnp.float32)

    params = init_params(key, input_size, num_classes)

    out = mlp_forward(x, params)
    out = jax.block_until_ready(out)

    # sanity checks
    assert out.shape == (B, num_classes)
    assert bool(jnp.all(jnp.isfinite(out)))
    # softmax rows sum to ~1 (approx reciprocal + bf16 matmuls/output -> loose tolerance)
    assert jnp.allclose(jnp.sum(out, axis=1), 1.0, atol=2e-2)
    # matches the f32 reference within bf16-level tolerance
    ref = mlp_ref(x, params)
    assert jnp.max(jnp.abs(out - ref)) < 5e-2
    print("KERNEL_OK")
</pallas_src>

<mosaic_0001>
module attributes {stable_mosaic.version = 11 : i64} {
  func.func @mlp_kernel(%arg0: i32, %arg1: memref<16x256xbf16, #tpu.memory_space<vmem>>, %arg2: memref<256x512xbf16, #tpu.memory_space<vmem>>, %arg3: memref<1x512xf32, #tpu.memory_space<vmem>>, %arg4: memref<512x256xbf16, #tpu.memory_space<vmem>>, %arg5: memref<1x256xf32, #tpu.memory_space<vmem>>, %arg6: memref<256x128xbf16, #tpu.memory_space<vmem>>, %arg7: memref<1x128xf32, #tpu.memory_space<vmem>>, %arg8: memref<128x128xbf16, #tpu.memory_space<vmem>>, %arg9: memref<1x128xf32, #tpu.memory_space<vmem>>, %arg10: memref<16x128xbf16, #tpu.memory_space<vmem>>) attributes {dimension_semantics = [#tpu.dimension_semantics<parallel>], iteration_bounds = array<i64: 1>, scalar_prefetch = 0 : i64, scratch_operands = 0 : i64, tpu.core_type = #tpu.core_type<tc>, window_params = [{transform_indices = @transform_0, window_bounds = array<i64: 16, 256>}, {pipeline_mode = #tpu.pipeline_mode<synchronous>, transform_indices = @transform_1, window_bounds = array<i64: 256, 512>}, {pipeline_mode = #tpu.pipeline_mode<synchronous>, transform_indices = @transform_2, window_bounds = array<i64: 1, 512>}, {pipeline_mode = #tpu.pipeline_mode<synchronous>, transform_indices = @transform_3, window_bounds = array<i64: 512, 256>}, {pipeline_mode = #tpu.pipeline_mode<synchronous>, transform_indices = @transform_4, window_bounds = array<i64: 1, 256>}, {pipeline_mode = #tpu.pipeline_mode<synchronous>, transform_indices = @transform_5, window_bounds = array<i64: 256, 128>}, {pipeline_mode = #tpu.pipeline_mode<synchronous>, transform_indices = @transform_6, window_bounds = array<i64: 1, 128>}, {pipeline_mode = #tpu.pipeline_mode<synchronous>, transform_indices = @transform_7, window_bounds = array<i64: 128, 128>}, {pipeline_mode = #tpu.pipeline_mode<synchronous>, transform_indices = @transform_8, window_bounds = array<i64: 1, 128>}, {transform_indices = @transform_9, window_bounds = array<i64: 16, 128>}]} {
    %c0 = arith.constant 0 : index
    %c0_0 = arith.constant 0 : index
    %0 = vector.load %arg1[%c0, %c0_0] : memref<16x256xbf16, #tpu.memory_space<vmem>>, vector<16x256xbf16>
    %c0_1 = arith.constant 0 : index
    %c0_2 = arith.constant 0 : index
    %1 = vector.load %arg2[%c0_1, %c0_2] : memref<256x512xbf16, #tpu.memory_space<vmem>>, vector<256x512xbf16>
    %cst = arith.constant dense<0.000000e+00> : vector<16x512xf32>
    %2 = tpu.matmul %0, %1, %cst {dimension_numbers = #tpu.dot_dimension_numbers<[1], [0], [0], [1], [0, 0, 1, 1], [], []>} : vector<16x256xbf16>, vector<256x512xbf16>, vector<16x512xf32> -> vector<16x512xf32>
    %c0_3 = arith.constant 0 : index
    %c0_4 = arith.constant 0 : index
    %3 = vector.load %arg3[%c0_3, %c0_4] : memref<1x512xf32, #tpu.memory_space<vmem>>, vector<1x512xf32>
    %4 = vector.broadcast %3 : vector<1x512xf32> to vector<16x512xf32>
    %5 = arith.addf %2, %4 : vector<16x512xf32>
    %cst_5 = arith.constant 0.000000e+00 : f32
    %6 = vector.broadcast %cst_5 : f32 to vector<16x512xf32>
    %7 = arith.maximumf %5, %6 : vector<16x512xf32>
    %8 = arith.truncf %7 : vector<16x512xf32> to vector<16x512xbf16>
    %c0_6 = arith.constant 0 : index
    %c0_7 = arith.constant 0 : index
    %9 = vector.load %arg4[%c0_6, %c0_7] : memref<512x256xbf16, #tpu.memory_space<vmem>>, vector<512x256xbf16>
    %cst_8 = arith.constant dense<0.000000e+00> : vector<16x256xf32>
    %10 = tpu.matmul %8, %9, %cst_8 {dimension_numbers = #tpu.dot_dimension_numbers<[1], [0], [0], [1], [0, 0, 1, 1], [], []>} : vector<16x512xbf16>, vector<512x256xbf16>, vector<16x256xf32> -> vector<16x256xf32>
    %c0_9 = arith.constant 0 : index
    %c0_10 = arith.constant 0 : index
    %11 = vector.load %arg5[%c0_9, %c0_10] : memref<1x256xf32, #tpu.memory_space<vmem>>, vector<1x256xf32>
    %12 = vector.broadcast %11 : vector<1x256xf32> to vector<16x256xf32>
    %13 = arith.addf %10, %12 : vector<16x256xf32>
    %cst_11 = arith.constant 0.000000e+00 : f32
    %14 = vector.broadcast %cst_11 : f32 to vector<16x256xf32>
    %15 = arith.maximumf %13, %14 : vector<16x256xf32>
    %16 = arith.truncf %15 : vector<16x256xf32> to vector<16x256xbf16>
    %c0_12 = arith.constant 0 : index
    %c0_13 = arith.constant 0 : index
    %17 = vector.load %arg6[%c0_12, %c0_13] : memref<256x128xbf16, #tpu.memory_space<vmem>>, vector<256x128xbf16>
    %cst_14 = arith.constant dense<0.000000e+00> : vector<16x128xf32>
    %18 = tpu.matmul %16, %17, %cst_14 {dimension_numbers = #tpu.dot_dimension_numbers<[1], [0], [0], [1], [0, 0, 1, 1], [], []>} : vector<16x256xbf16>, vector<256x128xbf16>, vector<16x128xf32> -> vector<16x128xf32>
    %c0_15 = arith.constant 0 : index
    %c0_16 = arith.constant 0 : index
    %19 = vector.load %arg7[%c0_15, %c0_16] : memref<1x128xf32, #tpu.memory_space<vmem>>, vector<1x128xf32>
    %20 = vector.broadcast %19 : vector<1x128xf32> to vector<16x128xf32>
    %21 = arith.addf %18, %20 : vector<16x128xf32>
    %cst_17 = arith.constant 0.000000e+00 : f32
    %22 = vector.broadcast %cst_17 : f32 to vector<16x128xf32>
    %23 = arith.maximumf %21, %22 : vector<16x128xf32>
    %24 = arith.truncf %23 : vector<16x128xf32> to vector<16x128xbf16>
    %c0_18 = arith.constant 0 : index
    %c0_19 = arith.constant 0 : index
    %25 = vector.load %arg8[%c0_18, %c0_19] : memref<128x128xbf16, #tpu.memory_space<vmem>>, vector<128x128xbf16>
    %cst_20 = arith.constant dense<0.000000e+00> : vector<16x128xf32>
    %26 = tpu.matmul %24, %25, %cst_20 {dimension_numbers = #tpu.dot_dimension_numbers<[1], [0], [0], [1], [0, 0, 1, 1], [], []>} : vector<16x128xbf16>, vector<128x128xbf16>, vector<16x128xf32> -> vector<16x128xf32>
    %c0_21 = arith.constant 0 : index
    %c0_22 = arith.constant 0 : index
    %27 = vector.load %arg9[%c0_21, %c0_22] : memref<1x128xf32, #tpu.memory_space<vmem>>, vector<1x128xf32>
    %28 = vector.broadcast %27 : vector<1x128xf32> to vector<16x128xf32>
    %29 = arith.addf %26, %28 : vector<16x128xf32>
    %cst_23 = arith.constant dense<0xFF800000> : vector<16xf32>
    %30 = vector.multi_reduction <maximumf>, %29, %cst_23 [1] : vector<16x128xf32> to vector<16xf32>
    %31 = vector.shape_cast %30 : vector<16xf32> to vector<16x1xf32>
    %32 = vector.broadcast %31 : vector<16x1xf32> to vector<16x128xf32>
    %33 = arith.subf %29, %32 : vector<16x128xf32>
    %34 = math.exp %33 : vector<16x128xf32>
    %cst_24 = arith.constant dense<0.000000e+00> : vector<16xf32>
    %35 = vector.multi_reduction <add>, %34, %cst_24 [1] : vector<16x128xf32> to vector<16xf32>
    %36 = vector.shape_cast %35 : vector<16xf32> to vector<16x1xf32>
    %37 = tpu.reciprocal %36 {approx = true} : vector<16x1xf32> -> vector<16x1xf32>
    %38 = vector.broadcast %37 : vector<16x1xf32> to vector<16x128xf32>
    %39 = arith.mulf %34, %38 : vector<16x128xf32>
    %40 = arith.truncf %39 : vector<16x128xf32> to vector<16x128xbf16>
    %c0_25 = arith.constant 0 : index
    %c0_26 = arith.constant 0 : index
    %41 = vector.load %arg10[%c0_25, %c0_26] : memref<16x128xbf16, #tpu.memory_space<vmem>>, vector<16x128xbf16>
    tpu.vector_store %arg10[%c0_25, %c0_26], %40 {strides = array<i32>} : memref<16x128xbf16, #tpu.memory_space<vmem>>, vector<16x128xbf16>,
    return
  }
  func.func @transform_0(%arg0: i32) -> (i32, i32) {
    %c0_i32 = arith.constant 0 : i32
    %c0_i32_0 = arith.constant 0 : i32
    return %arg0, %c0_i32 : i32, i32
  }
  func.func @transform_1(%arg0: i32) -> (i32, i32) {
    %c0_i32 = arith.constant 0 : i32
    %c0_i32_0 = arith.constant 0 : i32
    %c0_i32_1 = arith.constant 0 : i32
    return %c0_i32, %c0_i32_0 : i32, i32
  }
  func.func @transform_2(%arg0: i32) -> (i32, i32) {
    %c0_i32 = arith.constant 0 : i32
    %c0_i32_0 = arith.constant 0 : i32
    %c0_i32_1 = arith.constant 0 : i32
    return %c0_i32, %c0_i32_0 : i32, i32
  }
  func.func @transform_3(%arg0: i32) -> (i32, i32) {
    %c0_i32 = arith.constant 0 : i32
    %c0_i32_0 = arith.constant 0 : i32
    %c0_i32_1 = arith.constant 0 : i32
    return %c0_i32, %c0_i32_0 : i32, i32
  }
  func.func @transform_4(%arg0: i32) -> (i32, i32) {
    %c0_i32 = arith.constant 0 : i32
    %c0_i32_0 = arith.constant 0 : i32
    %c0_i32_1 = arith.constant 0 : i32
    return %c0_i32, %c0_i32_0 : i32, i32
  }
  func.func @transform_5(%arg0: i32) -> (i32, i32) {
    %c0_i32 = arith.constant 0 : i32
    %c0_i32_0 = arith.constant 0 : i32
    %c0_i32_1 = arith.constant 0 : i32
    return %c0_i32, %c0_i32_0 : i32, i32
  }
  func.func @transform_6(%arg0: i32) -> (i32, i32) {
    %c0_i32 = arith.constant 0 : i32
    %c0_i32_0 = arith.constant 0 : i32
    %c0_i32_1 = arith.constant 0 : i32
    return %c0_i32, %c0_i32_0 : i32, i32
  }
  func.func @transform_7(%arg0: i32) -> (i32, i32) {
    %c0_i32 = arith.constant 0 : i32
    %c0_i32_0 = arith.constant 0 : i32
    %c0_i32_1 = arith.constant 0 : i32
    return %c0_i32, %c0_i32_0 : i32, i32
  }
  func.func @transform_8(%arg0: i32) -> (i32, i32) {
    %c0_i32 = arith.constant 0 : i32
    %c0_i32_0 = arith.constant 0 : i32
    %c0_i32_1 = arith.constant 0 : i32
    return %c0_i32, %c0_i32_0 : i32, i32
  }
  func.func @transform_9(%arg0: i32) -> (i32, i32) {
    %c0_i32 = arith.constant 0 : i32
    %c0_i32_0 = arith.constant 0 : i32
    return %arg0, %c0_i32 : i32, i32
  }
}

</mosaic_0001>

<bundles_post_ra>
// kernel: tpu_custom_call.1
= control target key start
LH: loop header
LB: loop body
LE: loop exit
PB: predicated region body
PF: predicated region fallthrough
CT: control target
= control target key end

     0   :  { %14 = vsyncpa [#allocation3], 0  ;;  %s2548_s0 = inlined_call_operand.hbm [shape: bf16[16,256], index: 0, kind: input, shape index: {}]   ;;  %s2549_s1 = inlined_call_operand.hbm [shape: bf16[256,512], index: 1, kind: input, shape index: {}]   ;;  %s2550_s2 = inlined_call_operand.hbm [shape: f32[1,512], index: 2, kind: input, shape index: {}]   ;;  %s2551_s3 = inlined_call_operand.hbm [shape: bf16[512,256], index: 3, kind: input, shape index: {}]   ;;  %s2552_s4 = inlined_call_operand.vmem [shape: f32[1,256], index: 4, kind: input, shape index: {}]   ;;  %s2553_s5 = inlined_call_operand.hbm [shape: bf16[256,128], index: 5, kind: input, shape index: {}]   ;;  %s2554_s6 = inlined_call_operand.vmem [shape: f32[1,128], index: 6, kind: input, shape index: {}]   ;;  %s2555_s7 = inlined_call_operand.hbm [shape: bf16[128,128], index: 7, kind: input, shape index: {}]   ;;  %s2556_s8 = inlined_call_operand.vmem [shape: f32[1,128], index: 8, kind: input, shape index: {}]   ;;  %s2557_s9 = inlined_call_operand.hbm [shape: bf16[16,128], index: 9, kind: output, shape index: {}]  }
   0x1   :  { %15 = vsyncpa [#allocation6], 0 }
   0x2   :  { %16 = vsyncpa [#allocation9], 0 }
   0x3   :  { %17 = vsyncpa [#allocation12], 0  ;;  %s36_s11 = sshll.u32 %s2549_s1, 4  ;;  %s37_s11 = int_to_ptr.hbm [resolvable:$true] %s36_s11 }
   0x4   :  { %18 = vsyncpa [#allocation4], 0  ;;  %s2428_s12 = smov [#allocation5]   ;;  %s2429_s14 = smov 256  }
   0x5   :  { %s38_s13 = sshll.u32 %s2428_s12, 4  ;;  %s2430_s15 = smov 16   ;;  %s39_s13 = int_to_ptr.vmem [resolvable:$true] %s38_s13 }
   0x6   :  { %44 = dma.hbm_to_vmem [thread:$0]  %s37_s11, 8192, %s39_s13, [#allocation6], %s2429_s14, %s2429_s14, %s2430_s15  }
   0x7   :  { %s60_s18 = sshll.u32 %s2551_s3, 4  ;;  %s2431_s19 = smov [#allocation8]   ;;  %s61_s18 = int_to_ptr.hbm [resolvable:$true] %s60_s18 }
   0x8   :  { %s62_s20 = sshll.u32 %s2431_s19, 4  ;;  %s23_s23 = sshll.u32 %s2548_s0, 4  ;;  %s63_s20 = int_to_ptr.vmem [resolvable:$true] %s62_s20  ;;  %s24_s23 = int_to_ptr.hbm [resolvable:$true] %s23_s23 }
   0x9   :  { %s2432_s1 = smov 128   ;;  %s2433_s24 = smov 8  }
   0xa   :  { %68 = dma.hbm_to_vmem [thread:$0]  %s61_s18, 8192, %s63_s20, [#allocation9], %s2432_s1, %s2432_s1, %s2433_s24  }
   0xb   :  { %s50_s27 = sshll.u32 %s2550_s2, 4  ;;  %s2434_s28 = smov [#allocation2]   ;;  %s51_s27 = int_to_ptr.hbm [resolvable:$true] %s50_s27 }
   0xc   :  { %s25_s29 = sshll.u32 %s2434_s28, 4  ;;  %s2435_s3 = smov [#allocation7]   ;;  %s26_s29 = int_to_ptr.vmem [resolvable:$true] %s25_s29 }
   0xd   :  { %31 = dma.hbm_to_vmem [thread:$0]  %s24_s23, 256, %s26_s29, [#allocation3], %s2432_s1, %s2432_s1, %s2433_s24  }
   0xe   :  { %s52_s30 = sshll.u32 %s2435_s3, 4  ;;  %s75_s0 = sshll.u32 %s2553_s5, 4  ;;  %s53_s30 = int_to_ptr.vmem [resolvable:$true] %s52_s30  ;;  %s76_s0 = int_to_ptr.hbm [resolvable:$true] %s75_s0 }
   0xf   :  { %55 = dma.hbm_to_vmem [thread:$0]  %s51_s27, 64, %s53_s30, [#allocation6]  }
  0x10   :  { %s2436_s12 = smov [#allocation10]   ;;  %s90_s2 = sshll.u32 %s2555_s7, 4  ;;  %s91_s2 = int_to_ptr.hbm [resolvable:$true] %s90_s2 }
  0x11   :  { %s77_s13 = sshll.u32 %s2436_s12, 4  ;;  %s2437_s16 = smov 64   ;;  %s78_s13 = int_to_ptr.vmem [resolvable:$true] %s77_s13 }
  0x12   :  { %s2438_s17 = smov 4   ;;  %s2439_s18 = smov [#allocation11]  }
  0x13   :  { %83 = dma.hbm_to_vmem [thread:$0]  %s76_s0, 2048, %s78_s13, [#allocation9], %s2437_s16, %s2437_s16, %s2438_s17  }
  0x14   :  { %s92_s19 = sshll.u32 %s2439_s18, 4  ;;  %s93_s19 = int_to_ptr.vmem [resolvable:$true] %s92_s19 }
  0x15   :  { %98 = dma.hbm_to_vmem [thread:$0]  %s91_s2, 1024, %s93_s19, [#allocation12], %s2437_s16, %s2437_s16, %s2438_s17  }
  0x16   :  { %2418 = dma.done.wait [#allocation3], 256  }
  0x17   :  { %2419 = vsyncadd [#allocation3], 4294967040 }
  0x18   :  { %2420 = dma.done.wait [#allocation6], 8256  }
  0x19   :  { %2421 = vsyncadd [#allocation6], 4294959040 }
  0x1a   :  { %2422 = dma.done.wait [#allocation9], 10240  }
  0x1b   :  { %2423 = vsyncadd [#allocation9], 4294957056 }
  0x1c   :  { %2424 = dma.done.wait [#allocation12], 1024  }
  0x1d   :  { %2425 = vsyncadd [#allocation12], 4294966272  ;;  %v1574_v0 = vld [vmem:[#allocation5 + $0xe0] sm:$0xf]  ;;  %v2100_v1 = vld [vmem:[#allocation5 + $0xec] sm:$0xf0] }
  0x1e   :  { %v1702_v2 = vld [vmem:[#allocation5 + $0x1e0] sm:$0xf]  ;;  %v1575_v3 = vor.u32 %v2100_v1, %v1574_v0  ;;  %v2132_v4 = vld [vmem:[#allocation5 + $0x1ec] sm:$0xf0]  ;;  %v2098_v5 = vld [vmem:[#allocation5 + $0xe4] sm:$0xf] }
  0x1f   :  { %v1576_v6 = vld [vmem:[#allocation5 + $0xf0] sm:$0xf0]  ;;  %v1703_v7 = vor.u32 %v2132_v4, %v1702_v2  ;;  %v2130_v9 = vld [vmem:[#allocation5 + $0x1e4] sm:$0xf]  ;;  %v1558_v11 = vld [vmem:[#allocation5 + $0xc0] sm:$0xf] }
  0x20   :  { %v1579_v8 = vor.u32 %v2098_v5, %v1576_v6  ;;  %v1704_v10 = vld [vmem:[#allocation5 + $0x1f0] sm:$0xf0]  ;;  %531 = vmatpush.bf16.msra.mxu0 %v1575_v3  ;;  %v2096_v13 = vld [vmem:[#allocation5 + $0xcc] sm:$0xf0]  ;;  %v1686_v14 = vld [vmem:[#allocation5 + $0x1c0] sm:$0xf] }
  0x21   :  { %v1707_v12 = vor.u32 %v2130_v9, %v1704_v10  ;;  %v2128_v15 = vld [vmem:[#allocation5 + $0x1cc] sm:$0xf0]  ;;  %545 = vmatpush.bf16.msra.mxu1 %v1703_v7  ;;  %v1559_v16 = vor.u32 %v2096_v13, %v1558_v11  ;;  %v2094_v18 = vld [vmem:[#allocation5 + $0xc4] sm:$0xf]  ;;  %v1560_v19 = vld [vmem:[#allocation5 + $0xd0] sm:$0xf0] }
  0x22   :  { %559 = vmatpush.bf16.msra.mxu2 %v1579_v8  ;;  %v1687_v17 = vor.u32 %v2128_v15, %v1686_v14  ;;  %v2126_v20 = vld [vmem:[#allocation5 + $0x1c4] sm:$0xf]  ;;  %v1563_v21 = vor.u32 %v2094_v18, %v1560_v19  ;;  %v1688_v22 = vld [vmem:[#allocation5 + $0x1d0] sm:$0xf0]  ;;  %v1542_v23 = vld [vmem:[#allocation5 + $0xa0] sm:$0xf] }
  0x23   :  { %573 = vmatpush.bf16.msra.mxu3 %v1707_v12  ;;  %v2092_v24 = vld [vmem:[#allocation5 + $0xac] sm:$0xf0]  ;;  %v1691_v25 = vor.u32 %v2126_v20, %v1688_v22  ;;  %v1670_v26 = vld [vmem:[#allocation5 + $0x1a0] sm:$0xf]  ;;  %v2090_v28 = vld [vmem:[#allocation5 + $0xa4] sm:$0xf] }
  0x24   :  { %v2124_v27 = vld [vmem:[#allocation5 + $0x1ac] sm:$0xf0]  ;;  %532 = vmatpush.bf16.msra.mxu0 %v1559_v16  ;;  %v1543_v29 = vor.u32 %v2092_v24, %v1542_v23  ;;  %v1544_v30 = vld [vmem:[#allocation5 + $0xb0] sm:$0xf0]  ;;  %v2122_v31 = vld [vmem:[#allocation5 + $0x1a4] sm:$0xf] }
  0x25   :  { %v1672_v32 = vld [vmem:[#allocation5 + $0x1b0] sm:$0xf0]  ;;  %546 = vmatpush.bf16.msra.mxu1 %v1687_v17  ;;  %v1671_v33 = vor.u32 %v2124_v27, %v1670_v26  ;;  %v1547_v34 = vor.u32 %v2090_v28, %v1544_v30  ;;  %v1526_v35 = vld [vmem:[#allocation5 + $0x80] sm:$0xf]  ;;  %v2088_v36 = vld [vmem:[#allocation5 + $0x8c] sm:$0xf0] }
  0x26   :  { %560 = vmatpush.bf16.msra.mxu2 %v1563_v21  ;;  %v1654_v37 = vld [vmem:[#allocation5 + $0x180] sm:$0xf]  ;;  %v1675_v38 = vor.u32 %v2122_v31, %v1672_v32  ;;  %v2120_v39 = vld [vmem:[#allocation5 + $0x18c] sm:$0xf0]  ;;  %v2086_v40 = vld [vmem:[#allocation5 + $0x84] sm:$0xf]  ;;  %v1527_v44 = vor.u32 %v2088_v36, %v1526_v35 }
  0x27   :  { %574 = vmatpush.bf16.msra.mxu3 %v1691_v25  ;;  %v1528_v41 = vld [vmem:[#allocation5 + $0x90] sm:$0xf0]  ;;  %v2118_v42 = vld [vmem:[#allocation5 + $0x184] sm:$0xf]  ;;  %v1655_v45 = vor.u32 %v2120_v39, %v1654_v37  ;;  %v1510_v47 = vld [vmem:[#allocation5 + $0x60] sm:$0xf] }
  0x28   :  { %v1656_v43 = vld [vmem:[#allocation5 + $0x190] sm:$0xf0]  ;;  %533 = vmatpush.bf16.msra.mxu0 %v1543_v29  ;;  %v1531_v46 = vor.u32 %v2086_v40, %v1528_v41  ;;  %v2084_v48 = vld [vmem:[#allocation5 + $0x6c] sm:$0xf0]  ;;  %v1638_v49 = vld [vmem:[#allocation5 + $0x160] sm:$0xf] }
  0x29   :  { %547 = vmatpush.bf16.msra.mxu1 %v1671_v33  ;;  %v1659_v50 = vor.u32 %v2118_v42, %v1656_v43  ;;  %v2116_v51 = vld [vmem:[#allocation5 + $0x16c] sm:$0xf0]  ;;  %v2082_v52 = vld [vmem:[#allocation5 + $0x64] sm:$0xf]  ;;  %v1512_v53 = vld [vmem:[#allocation5 + $0x70] sm:$0xf0]  ;;  %v1511_v56 = vor.u32 %v2084_v48, %v1510_v47 }
  0x2a   :  { %561 = vmatpush.bf16.msra.mxu2 %v1547_v34  ;;  %v2114_v54 = vld [vmem:[#allocation5 + $0x164] sm:$0xf]  ;;  %v1640_v55 = vld [vmem:[#allocation5 + $0x170] sm:$0xf0]  ;;  %v1639_v57 = vor.u32 %v2116_v51, %v1638_v49  ;;  %v1515_v58 = vor.u32 %v2082_v52, %v1512_v53  ;;  %v1494_v59 = vld [vmem:[#allocation5 + $0x40] sm:$0xf] }
  0x2b   :  { %575 = vmatpush.bf16.msra.mxu3 %v1675_v38  ;;  %v2080_v60 = vld [vmem:[#allocation5 + $0x4c] sm:$0xf0]  ;;  %v1622_v61 = vld [vmem:[#allocation5 + $0x140] sm:$0xf]  ;;  %v1643_v62 = vor.u32 %v2114_v54, %v1640_v55  ;;  %v2078_v0 = vld [vmem:[#allocation5 + $0x44] sm:$0xf] }
  0x2c   :  { %534 = vmatpush.bf16.msra.mxu0 %v1527_v44  ;;  %v2112_v63 = vld [vmem:[#allocation5 + $0x14c] sm:$0xf0]  ;;  %v1496_v1 = vld [vmem:[#allocation5 + $0x50] sm:$0xf0]  ;;  %v2110_v2 = vld [vmem:[#allocation5 + $0x144] sm:$0xf]  ;;  %v1495_v4 = vor.u32 %v2080_v60, %v1494_v59 }
  0x2d   :  { %548 = vmatpush.bf16.msra.mxu1 %v1655_v45  ;;  %v1624_v3 = vld [vmem:[#allocation5 + $0x150] sm:$0xf0]  ;;  %v1623_v5 = vor.u32 %v2112_v63, %v1622_v61  ;;  %v1499_v6 = vor.u32 %v2078_v0, %v1496_v1  ;;  %v1478_v7 = vld [vmem:[#allocation5 + $0x20] sm:$0xf]  ;;  %v2076_v8 = vld [vmem:[#allocation5 + $0x2c] sm:$0xf0] }
  0x2e   :  { %562 = vmatpush.bf16.msra.mxu2 %v1531_v46  ;;  %v1606_v9 = vld [vmem:[#allocation5 + $0x120] sm:$0xf]  ;;  %v1627_v10 = vor.u32 %v2110_v2, %v1624_v3  ;;  %v2108_v11 = vld [vmem:[#allocation5 + $0x12c] sm:$0xf0]  ;;  %v2074_v12 = vld [vmem:[#allocation5 + $0x24] sm:$0xf]  ;;  %v1479_v16 = vor.u32 %v2076_v8, %v1478_v7 }
  0x2f   :  { %576 = vmatpush.bf16.msra.mxu3 %v1659_v50  ;;  %v1480_v13 = vld [vmem:[#allocation5 + $0x30] sm:$0xf0]  ;;  %v2106_v14 = vld [vmem:[#allocation5 + $0x124] sm:$0xf]  ;;  %v1462_v17 = vld [vmem:[#allocation5] sm:$0xf]  ;;  %v1607_v20 = vor.u32 %v2108_v11, %v1606_v9 }
  0x30   :  { %535 = vmatpush.bf16.msra.mxu0 %v1511_v56  ;;  %v1608_v15 = vld [vmem:[#allocation5 + $0x130] sm:$0xf0]  ;;  %v2072_v18 = vld [vmem:[#allocation5 + $0xc] sm:$0xf0]  ;;  %v1590_v19 = vld [vmem:[#allocation5 + $0x100] sm:$0xf]  ;;  %v1483_v21 = vor.u32 %v2074_v12, %v1480_v13 }
  0x31   :  { %549 = vmatpush.bf16.msra.mxu1 %v1639_v57  ;;  %v2104_v22 = vld [vmem:[#allocation5 + $0x10c] sm:$0xf0]  ;;  %v2070_v23 = vld [vmem:[#allocation5 + $0x4] sm:$0xf]  ;;  %v1464_v24 = vld [vmem:[#allocation5 + $0x10] sm:$0xf0]  ;;  %v1611_v25 = vor.u32 %v2106_v14, %v1608_v15  ;;  %v1463_v32 = vor.u32 %v2072_v18, %v1462_v17 }
  0x32   :  { %563 = vmatpush.bf16.msra.mxu2 %v1515_v58  ;;  %v2102_v26 = vld [vmem:[#allocation5 + $0x104] sm:$0xf]  ;;  %v1592_v27 = vld [vmem:[#allocation5 + $0x110] sm:$0xf0]  ;;  %v1582_v28 = vld [vmem:[#allocation5 + $0xe8] sm:$0xf]  ;;  %v1591_v36 = vor.u32 %v2104_v22, %v1590_v19  ;;  %v1467_v37 = vor.u32 %v2070_v23, %v1464_v24 }
  0x33   :  { %577 = vmatpush.bf16.msra.mxu3 %v1643_v62  ;;  %v2101_v29 = vld [vmem:[#allocation5 + $0xf4] sm:$0xf0]  ;;  %v1710_v30 = vld [vmem:[#allocation5 + $0x1e8] sm:$0xf]  ;;  %v2099_v33 = vld [vmem:[#allocation5 + $0xec] sm:$0xf]  ;;  %v1595_v41 = vor.u32 %v2102_v26, %v1592_v27 }
  0x34   :  { %536 = vmatpush.bf16.msra.mxu0 %v1495_v4  ;;  %v2133_v31 = vld [vmem:[#allocation5 + $0x1f4] sm:$0xf0]  ;;  %v1584_v34 = vld [vmem:[#allocation5 + $0xf8] sm:$0xf0]  ;;  %v2131_v35 = vld [vmem:[#allocation5 + $0x1ec] sm:$0xf]  ;;  %v1583_v42 = vor.u32 %v2101_v29, %v1582_v28 }
  0x35   :  { %550 = vmatpush.bf16.msra.mxu1 %v1623_v5  ;;  %v1712_v38 = vld [vmem:[#allocation5 + $0x1f8] sm:$0xf0]  ;;  %v1454_v39 = vld [vmem:[#allocation2] sm:$0xf]  ;;  %v2069_v40 = vld [vmem:[#allocation2 + $0x4] sm:$0xf0]  ;;  %v1711_v45 = vor.u32 %v2133_v31, %v1710_v30  ;;  %v1587_v46 = vor.u32 %v2099_v33, %v1584_v34 }
  0x36   :  { %564 = vmatpush.bf16.msra.mxu2 %v1499_v6  ;;  %v2068_v43 = vld [vmem:[#allocation2 + $0x4] sm:$0xf]  ;;  %v1456_v44 = vld [vmem:[#allocation2 + $0x8] sm:$0xf0]  ;;  %v1566_v47 = vld [vmem:[#allocation5 + $0xc8] sm:$0xf]  ;;  %v1715_v50 = vor.u32 %v2131_v35, %v1712_v38  ;;  %v2515_v51 = vor.u32 %v2069_v40, %v1454_v39 }
  0x37   :  { %578 = vmatpush.bf16.msra.mxu3 %v1627_v10  ;;  %v2097_v48 = vld [vmem:[#allocation5 + $0xd4] sm:$0xf0]  ;;  %v1694_v49 = vld [vmem:[#allocation5 + $0x1c8] sm:$0xf]  ;;  %v2095_v53 = vld [vmem:[#allocation5 + $0xcc] sm:$0xf]  ;;  %v2517_v55 = vor.u32 %v2068_v43, %v1456_v44 }
  0x38   :  { %537 = vmatpush.bf16.msra.mxu0 %v1479_v16  ;;  %v2129_v52 = vld [vmem:[#allocation5 + $0x1d4] sm:$0xf0]  ;;  %v1568_v54 = vld [vmem:[#allocation5 + $0xd8] sm:$0xf0]  ;;  %v2127_v56 = vld [vmem:[#allocation5 + $0x1cc] sm:$0xf]  ;;  %v1567_v58 = vor.u32 %v2097_v48, %v1566_v47 }
  0x39   :  { %551 = vmatpush.bf16.msra.mxu1 %v1607_v20  ;;  %v1696_v57 = vld [vmem:[#allocation5 + $0x1d8] sm:$0xf0]  ;;  %v1695_v59 = vor.u32 %v2129_v52, %v1694_v49  ;;  %v1571_v60 = vor.u32 %v2095_v53, %v1568_v54  ;;  %v1550_v61 = vld [vmem:[#allocation5 + $0xa8] sm:$0xf]  ;;  %v2093_v62 = vld [vmem:[#allocation5 + $0xb4] sm:$0xf0] }
  0x3a   :  { %565 = vmatpush.bf16.msra.mxu2 %v1483_v21  ;;  %v1678_v63 = vld [vmem:[#allocation5 + $0x1a8] sm:$0xf]  ;;  %v1699_v0 = vor.u32 %v2127_v56, %v1696_v57  ;;  %v2125_v1 = vld [vmem:[#allocation5 + $0x1b4] sm:$0xf0]  ;;  %v2091_v2 = vld [vmem:[#allocation5 + $0xac] sm:$0xf]  ;;  %v1551_v6 = vor.u32 %v2093_v62, %v1550_v61 }
  0x3b   :  { %579 = vmatpush.bf16.msra.mxu3 %v1611_v25  ;;  %v1552_v3 = vld [vmem:[#allocation5 + $0xb8] sm:$0xf0]  ;;  %v2123_v4 = vld [vmem:[#allocation5 + $0x1ac] sm:$0xf]  ;;  %v1679_v7 = vor.u32 %v2125_v1, %v1678_v63  ;;  %v1534_v9 = vld [vmem:[#allocation5 + $0x88] sm:$0xf] }
  0x3c   :  { %538 = vmatpush.bf16.msra.mxu0 %v1463_v32  ;;  %v1680_v5 = vld [vmem:[#allocation5 + $0x1b8] sm:$0xf0]  ;;  %v1555_v8 = vor.u32 %v2091_v2, %v1552_v3  ;;  %v2089_v10 = vld [vmem:[#allocation5 + $0x94] sm:$0xf0]  ;;  %v1662_v11 = vld [vmem:[#allocation5 + $0x188] sm:$0xf] }
  0x3d   :  { %552 = vmatpush.bf16.msra.mxu1 %v1591_v36  ;;  %v1683_v12 = vor.u32 %v2123_v4, %v1680_v5  ;;  %v2121_v13 = vld [vmem:[#allocation5 + $0x194] sm:$0xf0]  ;;  %v2087_v14 = vld [vmem:[#allocation5 + $0x8c] sm:$0xf]  ;;  %v1536_v15 = vld [vmem:[#allocation5 + $0x98] sm:$0xf0]  ;;  %v1535_v18 = vor.u32 %v2089_v10, %v1534_v9 }
  0x3e   :  { %566 = vmatpush.bf16.msra.mxu2 %v1467_v37  ;;  %v2119_v16 = vld [vmem:[#allocation5 + $0x18c] sm:$0xf]  ;;  %v1664_v17 = vld [vmem:[#allocation5 + $0x198] sm:$0xf0]  ;;  %v1663_v19 = vor.u32 %v2121_v13, %v1662_v11  ;;  %v1539_v20 = vor.u32 %v2087_v14, %v1536_v15  ;;  %v1518_v21 = vld [vmem:[#allocation5 + $0x68] sm:$0xf] }
  0x3f   :  { %580 = vmatpush.bf16.msra.mxu3 %v1595_v41  ;;  %539 = vmatmul.bf16.vlgmr.msra.gmra.mxu0 %v2515_v51  ;;  %v2085_v22 = vld [vmem:[#allocation5 + $0x74] sm:$0xf0]  ;;  %v1646_v23 = vld [vmem:[#allocation5 + $0x168] sm:$0xf]  ;;  %v1667_v24 = vor.u32 %v2119_v16, %v1664_v17  ;;  %v2083_v26 = vld [vmem:[#allocation5 + $0x6c] sm:$0xf] }
  0x40   :  { %587 = vmatpush.bf16.msrb.mxu0 %v1583_v42  ;;  %553 = vmatmul.bf16.vlgmr.msra.gmra.mxu1 %v2517_v55  ;;  %v2117_v25 = vld [vmem:[#allocation5 + $0x174] sm:$0xf0]  ;;  %v1520_v27 = vld [vmem:[#allocation5 + $0x78] sm:$0xf0]  ;;  %v2115_v28 = vld [vmem:[#allocation5 + $0x16c] sm:$0xf]  ;;  %v1519_v30 = vor.u32 %v2085_v22, %v1518_v21 }
  0x41   :  { %601 = vmatpush.bf16.msrb.mxu1 %v1711_v45  ;;  %567 = vmatmul.bf16.vlgmr.msra.gmra.mxu2 %v2515_v51  ;;  %v1648_v29 = vld [vmem:[#allocation5 + $0x178] sm:$0xf0]  ;;  %v1647_v31 = vor.u32 %v2117_v25, %v1646_v23  ;;  %v1523_v32 = vor.u32 %v2083_v26, %v1520_v27  ;;  %v1502_v33 = vld [vmem:[#allocation5 + $0x48] sm:$0xf]  ;;  %v2081_v34 = vld [vmem:[#allocation5 + $0x54] sm:$0xf0] }
  0x42   :  { %615 = vmatpush.bf16.msrb.mxu2 %v1587_v46  ;;  %581 = vmatmul.bf16.vlgmr.msra.gmra.mxu3 %v2517_v55  ;;  %v1630_v35 = vld [vmem:[#allocation5 + $0x148] sm:$0xf]  ;;  %v1651_v36 = vor.u32 %v2115_v28, %v1648_v29  ;;  %v2113_v37 = vld [vmem:[#allocation5 + $0x154] sm:$0xf0]  ;;  %v2079_v38 = vld [vmem:[#allocation5 + $0x4c] sm:$0xf]  ;;  %v1503_v42 = vor.u32 %v2081_v34, %v1502_v33 }
  0x43   :  { %629 = vmatpush.bf16.msrb.mxu3 %v1715_v50  ;;  %v1504_v39 = vld [vmem:[#allocation5 + $0x58] sm:$0xf0]  ;;  %v2111_v40 = vld [vmem:[#allocation5 + $0x14c] sm:$0xf]  ;;  %v1486_v43 = vld [vmem:[#allocation5 + $0x28] sm:$0xf]  ;;  %v1631_v44 = vor.u32 %v2113_v37, %v1630_v35 }
  0x44   :  { %588 = vmatpush.bf16.msrb.mxu0 %v1567_v58  ;;  %v1632_v41 = vld [vmem:[#allocation5 + $0x158] sm:$0xf0]  ;;  %v1507_v45 = vor.u32 %v2079_v38, %v1504_v39  ;;  %v2077_v46 = vld [vmem:[#allocation5 + $0x34] sm:$0xf0]  ;;  %v1614_v47 = vld [vmem:[#allocation5 + $0x128] sm:$0xf] }
  0x45   :  { %602 = vmatpush.bf16.msrb.mxu1 %v1695_v59  ;;  %v1635_v48 = vor.u32 %v2111_v40, %v1632_v41  ;;  %v2109_v49 = vld [vmem:[#allocation5 + $0x134] sm:$0xf0]  ;;  %v2075_v50 = vld [vmem:[#allocation5 + $0x2c] sm:$0xf]  ;;  %v1488_v52 = vld [vmem:[#allocation5 + $0x38] sm:$0xf0]  ;;  %v1487_v56 = vor.u32 %v2077_v46, %v1486_v43 }
  0x46   :  { %616 = vmatpush.bf16.msrb.mxu2 %v1571_v60  ;;  %v2107_v53 = vld [vmem:[#allocation5 + $0x12c] sm:$0xf]  ;;  %v1616_v54 = vld [vmem:[#allocation5 + $0x138] sm:$0xf0]  ;;  %v1470_v57 = vld [vmem:[#allocation5 + $0x8] sm:$0xf]  ;;  %v1615_v58 = vor.u32 %v2109_v49, %v1614_v47  ;;  %v1491_v59 = vor.u32 %v2075_v50, %v1488_v52 }
  0x47   :  { %630 = vmatpush.bf16.msrb.mxu3 %v1699_v0  ;;  %v2073_v60 = vld [vmem:[#allocation5 + $0x14] sm:$0xf0]  ;;  %v1598_v61 = vld [vmem:[#allocation5 + $0x108] sm:$0xf]  ;;  %v1619_v63 = vor.u32 %v2107_v53, %v1616_v54  ;;  %v2071_v0 = vld [vmem:[#allocation5 + $0xc] sm:$0xf] }
  0x48   :  { %589 = vmatpush.bf16.msrb.mxu0 %v1551_v6  ;;  %v2105_v62 = vld [vmem:[#allocation5 + $0x114] sm:$0xf0]  ;;  %v1472_v1 = vld [vmem:[#allocation5 + $0x18] sm:$0xf0]  ;;  %v2103_v2 = vld [vmem:[#allocation5 + $0x10c] sm:$0xf]  ;;  %v1471_v6 = vor.u32 %v2073_v60, %v1470_v57 }
  0x49   :  { %603 = vmatpush.bf16.msrb.mxu1 %v1679_v7  ;;  %v1600_v3 = vld [vmem:[#allocation5 + $0x118] sm:$0xf0]  ;;  %v1774_v4 = vld [vmem:[#allocation8 + $0x70] sm:$0xf]  ;;  %v1599_v9 = vor.u32 %v2105_v62, %v1598_v61  ;;  %v1475_v10 = vor.u32 %v2071_v0, %v1472_v1  ;;  %v1766_v13 = vld [vmem:[#allocation8 + $0x60] sm:$0xf] }
  0x4a   :  { %617 = vmatpush.bf16.msrb.mxu2 %v1555_v8  ;;  %v2149_v5 = vld [vmem:[#allocation8 + $0x74] sm:$0xf0]  ;;  %v1838_v7 = vld [vmem:[#allocation8 + $0xf0] sm:$0xf]  ;;  %v1603_v11 = vor.u32 %v2103_v2, %v1600_v3  ;;  %v2147_v14 = vld [vmem:[#allocation8 + $0x64] sm:$0xf0] }
  0x4b   :  { %631 = vmatpush.bf16.msrb.mxu3 %v1683_v12  ;;  %v2165_v8 = vld [vmem:[#allocation8 + $0xf4] sm:$0xf0]  ;;  %v1775_v12 = vor.u32 %v2149_v5, %v1774_v4  ;;  %v1830_v16 = vld [vmem:[#allocation8 + $0xe0] sm:$0xf]  ;;  %v2163_v17 = vld [vmem:[#allocation8 + $0xe4] sm:$0xf0] }
  0x4c   :  { %590 = vmatpush.bf16.msrb.mxu0 %v1535_v18  ;;  %v1839_v15 = vor.u32 %v2165_v8, %v1838_v7  ;;  %v1767_v18 = vor.u32 %v2147_v14, %v1766_v13  ;;  %v1831_v21 = vor.u32 %v2163_v17, %v1830_v16  ;;  %v1822_v22 = vld [vmem:[#allocation8 + $0xd0] sm:$0xf]  ;;  %v2161_v23 = vld [vmem:[#allocation8 + $0xd4] sm:$0xf0]  ;;  %v1750_v25 = vld [vmem:[#allocation8 + $0x40] sm:$0xf] }
  0x4d   :  { %604 = vmatpush.bf16.msrb.mxu1 %v1663_v19  ;;  %v1758_v19 = vld [vmem:[#allocation8 + $0x50] sm:$0xf]  ;;  %v2143_v26 = vld [vmem:[#allocation8 + $0x44] sm:$0xf0]  ;;  %v1823_v27 = vor.u32 %v2161_v23, %v1822_v22  ;;  %v1814_v28 = vld [vmem:[#allocation8 + $0xc0] sm:$0xf] }
  0x4e   :  { %618 = vmatpush.bf16.msrb.mxu2 %v1539_v20  ;;  %v2145_v20 = vld [vmem:[#allocation8 + $0x54] sm:$0xf0]  ;;  %v2159_v29 = vld [vmem:[#allocation8 + $0xc4] sm:$0xf0]  ;;  %v1806_v34 = vld [vmem:[#allocation8 + $0xb0] sm:$0xf] }
  0x4f   :  { %632 = vmatpush.bf16.msrb.mxu3 %v1667_v24  ;;  %v1759_v24 = vor.u32 %v2145_v20, %v1758_v19  ;;  %v1815_v33 = vor.u32 %v2159_v29, %v1814_v28  ;;  %v1798_v38 = vld [vmem:[#allocation8 + $0xa0] sm:$0xf]  ;;  %v2155_v39 = vld [vmem:[#allocation8 + $0xa4] sm:$0xf0]  ;;  %v1726_v41 = vld [vmem:[#allocation8 + $0x10] sm:$0xf] }
  0x50   :  { %591 = vmatpush.bf16.msrb.mxu0 %v1519_v30  ;;  %v1751_v30 = vor.u32 %v2143_v26, %v1750_v25  ;;  %v1799_v43 = vor.u32 %v2155_v39, %v1798_v38  ;;  %v2135_v46 = vld [vmem:[#allocation8 + $0x4] sm:$0xf0]  ;;  %v2181_v49 = vld [vmem:[#allocation8 + $0x174] sm:$0xf0]  ;;  %v2148_v50 = vld [vmem:[#allocation8 + $0x74] sm:$0xf] }
  0x51   :  { %605 = vmatpush.bf16.msrb.mxu1 %v1647_v31  ;;  %v1742_v31 = vld [vmem:[#allocation8 + $0x30] sm:$0xf]  ;;  %v1776_v53 = vld [vmem:[#allocation8 + $0x78] sm:$0xf0]  ;;  %v2179_v60 = vld [vmem:[#allocation8 + $0x164] sm:$0xf0] }
  0x52   :  { %619 = vmatpush.bf16.msrb.mxu2 %v1523_v32  ;;  %v2141_v32 = vld [vmem:[#allocation8 + $0x34] sm:$0xf0]  ;;  %v1790_v54 = vld [vmem:[#allocation8 + $0x90] sm:$0xf]  ;;  %v1779_v57 = vor.u32 %v2148_v50, %v1776_v53  ;;  %v2146_v62 = vld [vmem:[#allocation8 + $0x64] sm:$0xf] }
  0x53   :  { %633 = vmatpush.bf16.msrb.mxu3 %v1651_v36  ;;  %v1743_v35 = vor.u32 %v2141_v32, %v1742_v31  ;;  %v2139_v36 = vld [vmem:[#allocation8 + $0x24] sm:$0xf0]  ;;  %v1782_v0 = vld [vmem:[#allocation8 + $0x80] sm:$0xf]  ;;  %v1966_v3 = vld [vmem:[#allocation8 + $0x1f0] sm:$0xf] }
  0x54   :  { %592 = vmatpush.bf16.msrb.mxu0 %v1503_v42  ;;  %v2137_v42 = vld [vmem:[#allocation8 + $0x14] sm:$0xf0]  ;;  %v2151_v2 = vld [vmem:[#allocation8 + $0x84] sm:$0xf0]  ;;  %v2164_v7 = vld [vmem:[#allocation8 + $0xf4] sm:$0xf] }
  0x55   :  { %606 = vmatpush.bf16.msrb.mxu1 %v1631_v44  ;;  %v1727_v44 = vor.u32 %v2137_v42, %v1726_v41  ;;  %v2197_v4 = vld [vmem:[#allocation8 + $0x1f4] sm:$0xf0]  ;;  %v1783_v5 = vor.u32 %v2151_v2, %v1782_v0  ;;  %v1840_v8 = vld [vmem:[#allocation8 + $0xf8] sm:$0xf0]  ;;  %v1958_v16 = vld [vmem:[#allocation8 + $0x1e0] sm:$0xf] }
  0x56   :  { %620 = vmatpush.bf16.msrb.mxu2 %v1507_v45  ;;  %v1718_v45 = vld [vmem:[#allocation8] sm:$0xf]  ;;  %v1760_v14 = vld [vmem:[#allocation8 + $0x58] sm:$0xf0]  ;;  %v2195_v17 = vld [vmem:[#allocation8 + $0x1e4] sm:$0xf0] }
  0x57   :  { %634 = vmatpush.bf16.msrb.mxu3 %v1635_v48  ;;  %v1719_v47 = vor.u32 %v2135_v46, %v1718_v45  ;;  %v1902_v48 = vld [vmem:[#allocation8 + $0x170] sm:$0xf]  ;;  %v1959_v19 = vor.u32 %v2195_v17, %v1958_v16  ;;  %v1832_v20 = vld [vmem:[#allocation8 + $0xe8] sm:$0xf0]  ;;  %v1878_v22 = vld [vmem:[#allocation8 + $0x140] sm:$0xf] }
  0x58   :  { %593 = vmatpush.bf16.msrb.mxu0 %v1487_v56  ;;  %v1903_v52 = vor.u32 %v2181_v49, %v1902_v48  ;;  %v2153_v56 = vld [vmem:[#allocation8 + $0x94] sm:$0xf0]  ;;  %v2175_v23 = vld [vmem:[#allocation8 + $0x144] sm:$0xf0]  ;;  %v1752_v26 = vld [vmem:[#allocation8 + $0x48] sm:$0xf0] }
  0x59   :  { %607 = vmatpush.bf16.msrb.mxu1 %v1615_v58  ;;  %v1791_v58 = vor.u32 %v2153_v56, %v1790_v54  ;;  %v1879_v25 = vor.u32 %v2175_v23, %v1878_v22  ;;  %v1950_v28 = vld [vmem:[#allocation8 + $0x1d0] sm:$0xf]  ;;  %v2193_v29 = vld [vmem:[#allocation8 + $0x1d4] sm:$0xf0]  ;;  %v1824_v32 = vld [vmem:[#allocation8 + $0xd8] sm:$0xf0] }
  0x5a   :  { %621 = vmatpush.bf16.msrb.mxu2 %v1491_v59  ;;  %v1894_v59 = vld [vmem:[#allocation8 + $0x160] sm:$0xf]  ;;  %v1951_v31 = vor.u32 %v2193_v29, %v1950_v28  ;;  %v2191_v39 = vld [vmem:[#allocation8 + $0x1c4] sm:$0xf0]  ;;  %v1816_v42 = vld [vmem:[#allocation8 + $0xc8] sm:$0xf0] }
  0x5b   :  { %635 = vmatpush.bf16.msrb.mxu3 %v1619_v63  ;;  %v1895_v61 = vor.u32 %v2179_v60, %v1894_v59  ;;  %v1768_v63 = vld [vmem:[#allocation8 + $0x68] sm:$0xf0]  ;;  %v1942_v38 = vld [vmem:[#allocation8 + $0x1c0] sm:$0xf]  ;;  %v2171_v45 = vld [vmem:[#allocation8 + $0x124] sm:$0xf0] }
  0x5c   :  { %594 = vmatpush.bf16.msrb.mxu0 %v1471_v6  ;;  %v1771_v1 = vor.u32 %v2146_v62, %v1768_v63  ;;  %v1967_v6 = vor.u32 %v2197_v4, %v1966_v3  ;;  %v1943_v41 = vor.u32 %v2191_v39, %v1942_v38  ;;  %v2138_v46 = vld [vmem:[#allocation8 + $0x24] sm:$0xf]  ;;  %v1736_v48 = vld [vmem:[#allocation8 + $0x28] sm:$0xf0]  ;;  %v2527_v49 = vld [vmem:[#allocation7] sm:$0xf] }
  0x5d   :  { %608 = vmatpush.bf16.msrb.mxu1 %v1599_v9  ;;  %v1843_v9 = vor.u32 %v2164_v7, %v1840_v8  ;;  %v1739_v50 = vor.u32 %v2138_v46, %v1736_v48  ;;  %v2189_v53 = vld [vmem:[#allocation8 + $0x1b4] sm:$0xf0]  ;;  %v2156_v54 = vld [vmem:[#allocation8 + $0xb4] sm:$0xf]  ;;  %v1728_v63 = vld [vmem:[#allocation8 + $0x18] sm:$0xf0] }
  0x5e   :  { %622 = vmatpush.bf16.msrb.mxu2 %v1475_v10  ;;  %v1886_v10 = vld [vmem:[#allocation8 + $0x150] sm:$0xf]  ;;  %v2169_v59 = vld [vmem:[#allocation8 + $0x114] sm:$0xf0]  ;;  %v2136_v62 = vld [vmem:[#allocation8 + $0x14] sm:$0xf] }
  0x5f   :  { %636 = vmatpush.bf16.msrb.mxu3 %v1603_v11  ;;  %595 = vmatmul.bf16.vlgmr.msrb.gmra.mxu0 %v2515_v51  ;;  %v2177_v11 = vld [vmem:[#allocation8 + $0x154] sm:$0xf0]  ;;  %v1926_v0 = vld [vmem:[#allocation8 + $0x1a0] sm:$0xf]  ;;  %v2187_v2 = vld [vmem:[#allocation8 + $0x1a4] sm:$0xf0] }
  0x60   :  { %1045 = vmatpush.bf16.msra.mxu0 %v1775_v12  ;;  %609 = vmatmul.bf16.vlgmr.msrb.gmra.mxu1 %v2517_v55  ;;  %v2144_v12 = vld [vmem:[#allocation8 + $0x54] sm:$0xf]  ;;  %v1887_v13 = vor.u32 %v2177_v11, %v1886_v10  ;;  %v2154_v3 = vld [vmem:[#allocation8 + $0xa4] sm:$0xf]  ;;  %v1800_v4 = vld [vmem:[#allocation8 + $0xa8] sm:$0xf0] }
  0x61   :  { %1059 = vmatpush.bf16.msra.mxu1 %v1839_v15  ;;  %623 = vmatmul.bf16.vlgmr.msrb.gmra.mxu2 %v2515_v51  ;;  %v2157_v51 = vld [vmem:[#allocation8 + $0xb4] sm:$0xf0]  ;;  %v1763_v15 = vor.u32 %v2144_v12, %v1760_v14  ;;  %v193_v7 = vperm.slane %v2527_v49, 0  ;;  %v1846_v8 = vld [vmem:[#allocation8 + $0x100] sm:$0xf]  ;;  %s1436_s24 = sshll.u32 %s2557_s9, 4  ;;  %s1437_s24 = int_to_ptr.hbm [resolvable:$true] %s1436_s24 }
  0x62   :  { %637 = vmatmul.bf16.vlgmr.msrb.gmra.mxu3 %v2517_v55  ;;  %v1734_v55 = vld [vmem:[#allocation8 + $0x20] sm:$0xf]  ;;  %v1807_v37 = vor.u32 %v2157_v51, %v1806_v34  ;;  %1073 = vmatpush.bf16.msra.mxu2 %v1903_v52  ;;  %v1870_v34 = vld [vmem:[#allocation8 + $0x130] sm:$0xf]  ;;  %v2173_v51 = vld [vmem:[#allocation8 + $0x134] sm:$0xf0] }
  0x63   :  { %v1735_v40 = vor.u32 %v2139_v36, %v1734_v55  ;;  %1087 = vmatpush.bf16.msra.mxu3 %v1967_v6  ;;  %v1871_v55 = vor.u32 %v2173_v51, %v1870_v34  ;;  %v1744_v36 = vld [vmem:[#allocation8 + $0x38] sm:$0xf0]  ;;  %v1934_v52 = vld [vmem:[#allocation8 + $0x1b0] sm:$0xf]  ;;  %v1803_v6 = vor.u32 %v2154_v3, %v1800_v4  ;;  %v2134_v10 = vld [vmem:[#allocation8 + $0x4] sm:$0xf] }
  0x64   :  { %1046 = vmatpush.bf16.msra.mxu0 %v1767_v18  ;;  %v2162_v18 = vld [vmem:[#allocation8 + $0xe4] sm:$0xf]  ;;  %v1935_v56 = vor.u32 %v2189_v53, %v1934_v52  ;;  %v1720_v12 = vld [vmem:[#allocation8 + $0x8] sm:$0xf0]  ;;  %v1904_v14 = vld [vmem:[#allocation8 + $0x178] sm:$0xf0] }
  0x65   :  { %1060 = vmatpush.bf16.msra.mxu1 %v1831_v21  ;;  %v1835_v21 = vor.u32 %v2162_v18, %v1832_v20  ;;  %v1918_v17 = vld [vmem:[#allocation8 + $0x190] sm:$0xf]  ;;  %v2185_v18 = vld [vmem:[#allocation8 + $0x194] sm:$0xf0]  ;;  %v1792_v22 = vld [vmem:[#allocation8 + $0x98] sm:$0xf0] }
  0x66   :  { %1074 = vmatpush.bf16.msra.mxu2 %v1895_v61  ;;  %v1910_v29 = vld [vmem:[#allocation8 + $0x180] sm:$0xf]  ;;  %v2196_v34 = vld [vmem:[#allocation8 + $0x1f4] sm:$0xf]  ;;  %v1968_v51 = vld [vmem:[#allocation8 + $0x1f8] sm:$0xf0] }
  0x67   :  { %1088 = vmatpush.bf16.msra.mxu3 %v1959_v19  ;;  %v2152_v19 = vld [vmem:[#allocation8 + $0x94] sm:$0xf]  ;;  %v1888_v38 = vld [vmem:[#allocation8 + $0x158] sm:$0xf0]  ;;  %v2174_v52 = vld [vmem:[#allocation8 + $0x144] sm:$0xf] }
  0x68   :  { %1047 = vmatpush.bf16.msra.mxu0 %v1759_v24  ;;  %v2142_v24 = vld [vmem:[#allocation8 + $0x44] sm:$0xf]  ;;  %v1880_v53 = vld [vmem:[#allocation8 + $0x148] sm:$0xf0] }
  0x69   :  { %1061 = vmatpush.bf16.msra.mxu1 %v1823_v27  ;;  %v1755_v27 = vor.u32 %v2142_v24, %v1752_v26  ;;  %v1795_v24 = vor.u32 %v2152_v19, %v1792_v22  ;;  %v1896_v26 = vld [vmem:[#allocation8 + $0x168] sm:$0xf0]  ;;  %v1856_v19 = vld [vmem:[#allocation8 + $0x118] sm:$0xf0] }
  0x6a   :  { %1075 = vmatpush.bf16.msra.mxu2 %v1887_v13  ;;  %v2180_v13 = vld [vmem:[#allocation8 + $0x174] sm:$0xf] }
  0x6b   :  { %1089 = vmatpush.bf16.msra.mxu3 %v1951_v31  ;;  %v1907_v16 = vor.u32 %v2180_v13, %v1904_v14  ;;  %v2150_v31 = vld [vmem:[#allocation8 + $0x84] sm:$0xf] }
  0x6c   :  { %1048 = vmatpush.bf16.msra.mxu0 %v1751_v30  ;;  %v2160_v30 = vld [vmem:[#allocation8 + $0xd4] sm:$0xf] }
  0x6d   :  { %1062 = vmatpush.bf16.msra.mxu1 %v1815_v33  ;;  %v1827_v33 = vor.u32 %v2160_v30, %v1824_v32  ;;  %v2183_v30 = vld [vmem:[#allocation8 + $0x184] sm:$0xf0] }
  0x6e   :  { %1076 = vmatpush.bf16.msra.mxu2 %v1879_v25  ;;  %v2178_v25 = vld [vmem:[#allocation8 + $0x164] sm:$0xf]  ;;  %v1911_v32 = vor.u32 %v2183_v30, %v1910_v29 }
  0x6f   :  { %1090 = vmatpush.bf16.msra.mxu3 %v1943_v41  ;;  %v1899_v28 = vor.u32 %v2178_v25, %v1896_v26  ;;  %v1848_v25 = vld [vmem:[#allocation8 + $0x108] sm:$0xf0] }
  0x70   :  { %1049 = vmatpush.bf16.msra.mxu0 %v1743_v35  ;;  %v2140_v35 = vld [vmem:[#allocation8 + $0x34] sm:$0xf] }
  0x71   :  { %1063 = vmatpush.bf16.msra.mxu1 %v1807_v37  ;;  %v1747_v37 = vor.u32 %v2140_v35, %v1744_v36  ;;  %v194_v36 = vperm.slane %v2527_v49, 1 }
  0x72   :  { %1077 = vmatpush.bf16.msra.mxu2 %v1871_v55  ;;  %v1971_v55 = vor.u32 %v2196_v34, %v1968_v51  ;;  %v2182_v34 = vld [vmem:[#allocation8 + $0x184] sm:$0xf]  ;;  %v1912_v51 = vld [vmem:[#allocation8 + $0x188] sm:$0xf0] }
  0x73   :  { %1091 = vmatpush.bf16.msra.mxu3 %v1935_v56 }
  0x74   :  { %1050 = vmatpush.bf16.msra.mxu0 %v1735_v40  ;;  %v2158_v40 = vld [vmem:[#allocation8 + $0xc4] sm:$0xf] }
  0x75   :  { %1064 = vmatpush.bf16.msra.mxu1 %v1799_v43  ;;  %v1819_v43 = vor.u32 %v2158_v40, %v1816_v42 }
  0x78   :  { %1051 = vmatpush.bf16.msra.mxu0 %v1727_v44  ;;  %v1862_v44 = vld [vmem:[#allocation8 + $0x120] sm:$0xf] }
  0x79   :  { %1065 = vmatpush.bf16.msra.mxu1 %v1791_v58  ;;  %v1854_v58 = vld [vmem:[#allocation8 + $0x110] sm:$0xf] }
  0x7a   :  { %v1855_v61 = vor.u32 %v2169_v59, %v1854_v58  ;;  %v2192_v58 = vld [vmem:[#allocation8 + $0x1d4] sm:$0xf]  ;;  %v1952_v59 = vld [vmem:[#allocation8 + $0x1d8] sm:$0xf0] }
  0x7c   :  { %1052 = vmatpush.bf16.msra.mxu0 %v1719_v47  ;;  %v1863_v47 = vor.u32 %v2171_v45, %v1862_v44  ;;  %v2194_v44 = vld [vmem:[#allocation8 + $0x1e4] sm:$0xf]  ;;  %v1960_v45 = vld [vmem:[#allocation8 + $0x1e8] sm:$0xf0] }
  0x7d   :  { %1066 = vmatpush.bf16.msra.mxu1 %v1783_v5  ;;  %v1927_v5 = vor.u32 %v2187_v2, %v1926_v0  ;;  %v1963_v48 = vor.u32 %v2194_v44, %v1960_v45  ;;  %v1872_v0 = vld [vmem:[#allocation8 + $0x138] sm:$0xf0] }
  0x7e   :  { %1078 = vmatpush.bf16.msra.mxu2 %v1863_v47 }
  0x7f   :  { %1092 = vmatpush.bf16.msra.mxu3 %v1927_v5 }
  0x80   :  { %1101 = vmatpush.bf16.msrb.mxu0 %v1779_v57  ;;  %v1808_v57 = vld [vmem:[#allocation8 + $0xb8] sm:$0xf0] }
  0x81   :  { %1115 = vmatpush.bf16.msrb.mxu1 %v1843_v9  ;;  %v1811_v60 = vor.u32 %v2156_v54, %v1808_v57  ;;  %v2167_v9 = vld [vmem:[#allocation8 + $0x104] sm:$0xf0]  ;;  %v1883_v57 = vor.u32 %v2174_v52, %v1880_v53 }
  0x82   :  { %1079 = vmatpush.bf16.msra.mxu2 %v1855_v61  ;;  %v1847_v11 = vor.u32 %v2167_v9, %v1846_v8  ;;  %v1955_v61 = vor.u32 %v2192_v58, %v1952_v59  ;;  %v2205_v58 = vld [vmem:[#allocation10 + $0x38] sm:$0xff]  ;;  %v2204_v59 = vld [vmem:[#allocation10 + $0x30] sm:$0xff] }
  0x84   :  { %1102 = vmatpush.bf16.msrb.mxu0 %v1771_v1  ;;  %v1731_v1 = vor.u32 %v2136_v62, %v1728_v63  ;;  %v2172_v63 = vld [vmem:[#allocation8 + $0x134] sm:$0xf] }
  0x85   :  { %1116 = vmatpush.bf16.msrb.mxu1 %v1835_v21  ;;  %v1919_v21 = vor.u32 %v2185_v18, %v1918_v17  ;;  %v1875_v3 = vor.u32 %v2172_v63, %v1872_v0  ;;  %v2168_v18 = vld [vmem:[#allocation8 + $0x114] sm:$0xf]  ;;  %v2213_v63 = vld [vmem:[#allocation10 + $0x78] sm:$0xff] }
  0x86   :  { %1080 = vmatpush.bf16.msra.mxu2 %v1847_v11  ;;  %v2170_v11 = vld [vmem:[#allocation8 + $0x124] sm:$0xf]  ;;  %v1859_v22 = vor.u32 %v2168_v18, %v1856_v19  ;;  %v2200_v0 = vld [vmem:[#allocation10 + $0x10] sm:$0xff] }
  0x87   :  { %1093 = vmatpush.bf16.msra.mxu3 %v1919_v21 }
  0x88   :  { %1103 = vmatpush.bf16.msrb.mxu0 %v1763_v15  ;;  %v1723_v15 = vor.u32 %v2134_v10, %v1720_v12  ;;  %v1864_v12 = vld [vmem:[#allocation8 + $0x128] sm:$0xf0] }
  0x89   :  { %1117 = vmatpush.bf16.msrb.mxu1 %v1827_v33  ;;  %v1784_v33 = vld [vmem:[#allocation8 + $0x88] sm:$0xf0]  ;;  %v1867_v13 = vor.u32 %v2170_v11, %v1864_v12 }
  0x8a   :  { %1129 = vmatpush.bf16.msrb.mxu2 %v1907_v16  ;;  %v1787_v35 = vor.u32 %v2150_v31, %v1784_v33  ;;  %v1936_v16 = vld [vmem:[#allocation8 + $0x1b8] sm:$0xf0]  ;;  %v719_v11 = vld [vmem:[%s2552_s4] sm:$0x3] }
  0x8b   :  { %1094 = vmatpush.bf16.msra.mxu3 %v1911_v32  ;;  %v195_v32 = vperm.slane %v2527_v49, 2 }
  0x8c   :  { %1104 = vmatpush.bf16.msrb.mxu0 %v1755_v27 }
  0x8d   :  { %1118 = vmatpush.bf16.msrb.mxu1 %v1819_v43 }
  0x8e   :  { %1130 = vmatpush.bf16.msrb.mxu2 %v1899_v28  ;;  %v1920_v28 = vld [vmem:[#allocation8 + $0x198] sm:$0xf0] }
  0x8f   :  { %1143 = vmatpush.bf16.msrb.mxu3 %v1971_v55 }
  0x90   :  { %1105 = vmatpush.bf16.msrb.mxu0 %v1747_v37  ;;  %v2176_v37 = vld [vmem:[#allocation8 + $0x154] sm:$0xf] }
  0x91   :  { %1119 = vmatpush.bf16.msrb.mxu1 %v1811_v60  ;;  %v1891_v41 = vor.u32 %v2176_v37, %v1888_v38  ;;  %v196_v37 = vperm.slane %v2527_v49, 3 }
  0x93   :  { %1131 = vmatpush.bf16.msrb.mxu2 %v1891_v41  ;;  %1144 = vmatpush.bf16.msrb.mxu3 %v1963_v48 }
  0x94   :  { %1106 = vmatpush.bf16.msrb.mxu0 %v1739_v50 }
  0x95   :  { %1120 = vmatpush.bf16.msrb.mxu1 %v1803_v6  ;;  %v2190_v6 = vld [vmem:[#allocation8 + $0x1c4] sm:$0xf] }
  0x97   :  { %1132 = vmatpush.bf16.msrb.mxu2 %v1883_v57  ;;  %1145 = vmatpush.bf16.msrb.mxu3 %v1955_v61  ;;  %v2202_v61 = vld [vmem:[#allocation10 + $0x20] sm:$0xff] }
  0x98   :  { %1107 = vmatpush.bf16.msrb.mxu0 %v1731_v1 }
  0x99   :  { %1121 = vmatpush.bf16.msrb.mxu1 %v1795_v24  ;;  %v2166_v24 = vld [vmem:[#allocation8 + $0x104] sm:$0xf] }
  0x9a   :  { %v1851_v29 = vor.u32 %v2166_v24, %v1848_v25 }
  0x9b   :  { %1133 = vmatpush.bf16.msrb.mxu2 %v1875_v3  ;;  %v2211_v3 = vld [vmem:[#allocation10 + $0x68] sm:$0xff] }
  0x9c   :  { %1108 = vmatpush.bf16.msrb.mxu0 %v1723_v15  ;;  %v2188_v15 = vld [vmem:[#allocation8 + $0x1b4] sm:$0xf] }
  0x9d   :  { %1122 = vmatpush.bf16.msrb.mxu1 %v1787_v35  ;;  %v1939_v17 = vor.u32 %v2188_v15, %v1936_v16  ;;  %v1915_v35 = vor.u32 %v2182_v34, %v1912_v51 }
  0x9f   :  { %1134 = vmatpush.bf16.msrb.mxu2 %v1867_v13  ;;  %v721_v13 = vperm.slane %v719_v11, 0 }
  0xa3   :  { %1135 = vmatpush.bf16.msrb.mxu2 %v1859_v22 }
  0xa7   :  { %1136 = vmatpush.bf16.msrb.mxu2 %v1851_v29 }
  0xbc   :  { %v540_v20 = vpop.f32.mrf.mxu0 }
  0xbd   :  { %v554_v23 = vpop.f32.mrf.mxu1  ;;  %v541_v27 = vadd.f32 %v540_v20, %v193_v7  ;;  %v2186_v20 = vld [vmem:[#allocation8 + $0x1a4] sm:$0xf] }
  0xbf   :  { %v555_v39 = vadd.f32 %v554_v23, %v541_v27  ;;  %v1928_v23 = vld [vmem:[#allocation8 + $0x1a8] sm:$0xf0]  ;;  %v2184_v27 = vld [vmem:[#allocation8 + $0x194] sm:$0xf] }
  0xc0   :  { %v1931_v26 = vor.u32 %v2186_v20, %v1928_v23  ;;  %v1923_v30 = vor.u32 %v2184_v27, %v1920_v28 }
  0xc1   :  { %v643_v54 = vmax.f32 %v555_v39, 0.0 }
  0xc4   :  { %v568_v40 = vpop.f32.mrf.mxu2  ;;  %v542_v42 = vpop.f32.mrf.mxu0 }
  0xc5   :  { %v582_v43 = vpop.f32.mrf.mxu3  ;;  %v543_v46 = vadd.f32 %v542_v42, %v193_v7  ;;  %v556_v47 = vpop.f32.mrf.mxu1  ;;  %v569_v50 = vadd.f32 %v568_v40, %v194_v36  ;;  %v1944_v7 = vld [vmem:[#allocation8 + $0x1c8] sm:$0xf0] }
  0xc6   :  { %v1947_v8 = vor.u32 %v2190_v6, %v1944_v7  ;;  %v2209_v6 = vld [vmem:[#allocation10 + $0x58] sm:$0xff] }
  0xc7   :  { %v557_v56 = vadd.f32 %v556_v47, %v543_v46  ;;  %v583_v62 = vadd.f32 %v582_v43, %v569_v50 }
  0xc8   :  { %1146 = vmatpush.bf16.msrb.mxu3 %v1947_v8  ;;  %v2208_v8 = vld [vmem:[#allocation10 + $0x50] sm:$0xff] }
  0xc9   :  { %v647_v60 = vmax.f32 %v557_v56, 0.0  ;;  %v644_v9 = vmax.f32 %v583_v62, 0.0  ;;  %v2201_v62 = vld [vmem:[#allocation10 + $0x18] sm:$0xff] }
  0xcb   :  { %v651_v1 = vpack.c.bf16 %v647_v60, %v643_v54  ;;  %v2203_v60 = vld [vmem:[#allocation10 + $0x28] sm:$0xff] }
  0xcc   :  { %v570_v2 = vpop.f32.mrf.mxu2  ;;  %1147 = vmatpush.bf16.msrb.mxu3 %v1939_v17 }
  0xcd   :  { %v571_v4 = vadd.f32 %v570_v2, %v194_v36  ;;  %v584_v5 = vpop.f32.mrf.mxu3  ;;  %1053 = vmatmul.bf16.vlgmr.msra.gmra.mxu0 %v651_v1  ;;  %v2199_v2 = vld [vmem:[#allocation10 + $0x8] sm:$0xff] }
  0xce   :  { %1295 = vmatpush.bf16.msra.mxu0 %v2205_v58  ;;  %v2214_v58 = vld [vmem:[#allocation11] sm:$0xff] }
  0xcf   :  { %v585_v10 = vadd.f32 %v584_v5, %v571_v4  ;;  %v2198_v4 = vld [vmem:[#allocation10] sm:$0xff] }
  0xd0   :  { %1148 = vmatpush.bf16.msrb.mxu3 %v1931_v26  ;;  %v2210_v5 = vld [vmem:[#allocation10 + $0x60] sm:$0xff] }
  0xd1   :  { %v648_v14 = vmax.f32 %v585_v10, 0.0  ;;  %v2207_v10 = vld [vmem:[#allocation10 + $0x48] sm:$0xff] }
  0xd2   :  { %1296 = vmatpush.bf16.msra.mxu0 %v2204_v59 }
  0xd3   :  { %v652_v21 = vpack.c.bf16 %v648_v14, %v644_v9  ;;  %v2206_v14 = vld [vmem:[#allocation10 + $0x40] sm:$0xff] }
  0xd4   :  { %1149 = vmatpush.bf16.msrb.mxu3 %v1923_v30 }
  0xd5   :  { %1067 = vmatmul.bf16.vlgmr.msra.gmra.mxu1 %v652_v21 }
  0xd6   :  { %1297 = vmatpush.bf16.msra.mxu0 %v2203_v60  ;;  %1309 = vmatpush.bf16.msra.mxu1 %v2213_v63 }
  0xd8   :  { %1150 = vmatpush.bf16.msrb.mxu3 %v1915_v35 }
  0xda   :  { %1298 = vmatpush.bf16.msra.mxu0 %v2202_v61  ;;  %v2240_v61 = vld [vmem:[%s2554_s6] ss:$0 sm:$0xff]  ;;  %s2440_s6 = smov [#allocation13]  }
  0xdc   :  { %v596_v31 = vpop.f32.mrf.mxu0 }
  0xdd   :  { %v610_v33 = vpop.f32.mrf.mxu1  ;;  %1109 = vmatmul.bf16.vlgmr.msrb.gmra.mxu0 %v651_v1  ;;  %v597_v55 = vadd.f32 %v596_v31, %v195_v32  ;;  %v2212_v1 = vld [vmem:[#allocation10 + $0x70] sm:$0xff] }
  0xde   :  { %1299 = vmatpush.bf16.msra.mxu0 %v2201_v62  ;;  %1310 = vmatpush.bf16.msra.mxu1 %v2212_v1 }
  0xdf   :  { %v611_v40 = vadd.f32 %v610_v33, %v597_v55  ;;  %v722_v33 = vperm.slane %v719_v11, 1 }
  0xe1   :  { %v645_v45 = vmax.f32 %v611_v40, 0.0 }
  0xe2   :  { %1300 = vmatpush.bf16.msra.mxu0 %v2200_v0  ;;  %1311 = vmatpush.bf16.msra.mxu1 %v2211_v3 }
  0xe4   :  { %v624_v36 = vpop.f32.mrf.mxu2  ;;  %v598_v39 = vpop.f32.mrf.mxu0 }
  0xe5   :  { %v638_v38 = vpop.f32.mrf.mxu3  ;;  %v599_v41 = vadd.f32 %v598_v39, %v195_v32  ;;  %v612_v42 = vpop.f32.mrf.mxu1  ;;  %1123 = vmatmul.bf16.vlgmr.msrb.gmra.mxu1 %v652_v21  ;;  %v625_v44 = vadd.f32 %v624_v36, %v196_v37 }
  0xe6   :  { %1301 = vmatpush.bf16.msra.mxu0 %v2199_v2  ;;  %1312 = vmatpush.bf16.msra.mxu1 %v2210_v5 }
  0xe7   :  { %v613_v43 = vadd.f32 %v612_v42, %v599_v41  ;;  %v639_v50 = vadd.f32 %v638_v38, %v625_v44 }
  0xe9   :  { %v649_v46 = vmax.f32 %v613_v43, 0.0  ;;  %v646_v56 = vmax.f32 %v639_v50, 0.0  ;;  %v2221_v50 = vld [vmem:[#allocation11 + $0x38] sm:$0xff] }
  0xea   :  { %1302 = vmatpush.bf16.msra.mxu0 %v2198_v4  ;;  %1313 = vmatpush.bf16.msra.mxu1 %v2209_v6 }
  0xeb   :  { %v653_v47 = vpack.c.bf16 %v649_v46, %v645_v45 }
  0xec   :  { %v626_v48 = vpop.f32.mrf.mxu2 }
  0xed   :  { %v627_v52 = vadd.f32 %v626_v48, %v196_v37  ;;  %v640_v53 = vpop.f32.mrf.mxu3  ;;  %1081 = vmatmul.bf16.vlgmr.msra.gmra.mxu2 %v653_v47 }
  0xee   :  { %1314 = vmatpush.bf16.msra.mxu1 %v2208_v8  ;;  %1394 = vmatpush.bf16.msra.mxu2 %v2221_v50 }
  0xef   :  { %v641_v54 = vadd.f32 %v640_v53, %v627_v52  ;;  %v2220_v52 = vld [vmem:[#allocation11 + $0x30] sm:$0xff]  ;;  %v2219_v53 = vld [vmem:[#allocation11 + $0x28] sm:$0xff] }
  0xf1   :  { %v650_v57 = vmax.f32 %v641_v54, 0.0  ;;  %v2218_v54 = vld [vmem:[#allocation11 + $0x20] sm:$0xff] }
  0xf2   :  { %1315 = vmatpush.bf16.msra.mxu1 %v2207_v10  ;;  %1395 = vmatpush.bf16.msra.mxu2 %v2220_v52 }
  0xf3   :  { %v654_v49 = vpack.c.bf16 %v650_v57, %v646_v56  ;;  %v2217_v56 = vld [vmem:[#allocation11 + $0x18] sm:$0xff]  ;;  %v2216_v57 = vld [vmem:[#allocation11 + $0x10] sm:$0xff] }
  0xf5   :  { %1095 = vmatmul.bf16.vlgmr.msra.gmra.mxu3 %v654_v49 }
  0xf6   :  { %1316 = vmatpush.bf16.msra.mxu1 %v2206_v14  ;;  %1396 = vmatpush.bf16.msra.mxu2 %v2219_v53 }
  0xfa   :  { %1397 = vmatpush.bf16.msra.mxu2 %v2218_v54 }
  0xfd   :  { %1137 = vmatmul.bf16.vlgmr.msrb.gmra.mxu2 %v653_v47 }
  0xfe   :  { %1398 = vmatpush.bf16.msra.mxu2 %v2217_v56 }
 0x102   :  { %1399 = vmatpush.bf16.msra.mxu2 %v2216_v57 }
 0x105   :  { %1151 = vmatmul.bf16.vlgmr.msrb.gmra.mxu3 %v654_v49  ;;  %v2215_v49 = vld [vmem:[#allocation11 + $0x8] sm:$0xff] }
 0x106   :  { %1400 = vmatpush.bf16.msra.mxu2 %v2215_v49 }
 0x10a   :  { %1401 = vmatpush.bf16.msra.mxu2 %v2214_v58 }
 0x14a   :  { %v1054_v7 = vpop.f32.mrf.mxu0 }
 0x14b   :  { %v1055_v17 = vadd.f32 %v1054_v7, %v721_v13  ;;  %v2241_v7 = vld [vmem:[%s2556_s8] ss:$0 sm:$0xff]  ;;  %s1434_s8 = sshll.u32 %s2440_s6, 4  ;;  %s1435_s8 = int_to_ptr.vmem [resolvable:$true] %s1434_s8 }
 0x152   :  { %v1068_v9 = vpop.f32.mrf.mxu1  ;;  %v1056_v15 = vpop.f32.mrf.mxu0 }
 0x153   :  { %v1069_v20 = vadd.f32 %v1068_v9, %v1055_v17  ;;  %v1057_v21 = vadd.f32 %v1056_v15, %v721_v13 }
 0x15a   :  { %v1070_v16 = vpop.f32.mrf.mxu1  ;;  %v1110_v24 = vpop.f32.mrf.mxu0 }
 0x15b   :  { %v1071_v22 = vadd.f32 %v1070_v16, %v1057_v21  ;;  %v1111_v55 = vadd.f32 %v1110_v24, %v722_v33 }
 0x162   :  { %v1124_v27 = vpop.f32.mrf.mxu1  ;;  %v1112_v51 = vpop.f32.mrf.mxu0 }
 0x163   :  { %v1125_v37 = vadd.f32 %v1124_v27, %v1111_v55  ;;  %v1113_v38 = vadd.f32 %v1112_v51, %v722_v33 }
 0x16a   :  { %v1126_v36 = vpop.f32.mrf.mxu1 }
 0x16b   :  { %v1127_v40 = vadd.f32 %v1126_v36, %v1113_v38 }
 0x170   :  { %v1082_v12 = vpop.f32.mrf.mxu2 }
 0x171   :  { %v1083_v23 = vadd.f32 %v1082_v12, %v1069_v20 }
 0x178   :  { %v1096_v18 = vpop.f32.mrf.mxu3  ;;  %v1084_v19 = vpop.f32.mrf.mxu2 }
 0x179   :  { %v1097_v25 = vadd.f32 %v1096_v18, %v1083_v23  ;;  %v1085_v26 = vadd.f32 %v1084_v19, %v1071_v22 }
 0x17b   :  { %v1157_v31 = vmax.f32 %v1097_v25, 0.0 }
 0x180   :  { %v1098_v28 = vpop.f32.mrf.mxu3  ;;  %v1138_v30 = vpop.f32.mrf.mxu2 }
 0x181   :  { %v1099_v29 = vadd.f32 %v1098_v28, %v1085_v26  ;;  %v1139_v41 = vadd.f32 %v1138_v30, %v1125_v37 }
 0x183   :  { %v1159_v32 = vmax.f32 %v1099_v29, 0.0 }
 0x185   :  { %v1161_v34 = vpack.c.bf16 %v1159_v32, %v1157_v31 }
 0x187   :  { %1303 = vmatmul.bf16.vlgmr.msra.gmra.mxu0 %v1161_v34 }
 0x188   :  { %v1152_v35 = vpop.f32.mrf.mxu3  ;;  %v1140_v39 = vpop.f32.mrf.mxu2 }
 0x189   :  { %v1153_v42 = vadd.f32 %v1152_v35, %v1139_v41  ;;  %v1141_v43 = vadd.f32 %v1140_v39, %v1127_v40 }
 0x18b   :  { %v1158_v46 = vmax.f32 %v1153_v42, 0.0 }
 0x190   :  { %v1154_v44 = vpop.f32.mrf.mxu3 }
 0x191   :  { %v1155_v45 = vadd.f32 %v1154_v44, %v1141_v43 }
 0x193   :  { %v1160_v47 = vmax.f32 %v1155_v45, 0.0 }
 0x195   :  { %v1162_v48 = vpack.c.bf16 %v1160_v47, %v1158_v46 }
 0x197   :  { %1317 = vmatmul.bf16.vlgmr.msra.gmra.mxu1 %v1162_v48 }
 0x204   :  { %v1304_v59 = vpop.f32.mrf.mxu0 }
 0x205   :  { %v1305_v63 = vadd.f32 %v2240_v61, %v1304_v59 }
 0x20c   :  { %v1306_v62 = vpop.f32.mrf.mxu0 }
 0x20d   :  { %v1307_v0 = vadd.f32 %v2240_v61, %v1306_v62 }
 0x214   :  { %v1318_v60 = vpop.f32.mrf.mxu1 }
 0x215   :  { %v1319_v1 = vadd.f32 %v1318_v60, %v1305_v63 }
 0x217   :  { %v1323_v4 = vmax.f32 %v1319_v1, 0.0 }
 0x21c   :  { %v1320_v2 = vpop.f32.mrf.mxu1 }
 0x21d   :  { %v1321_v3 = vadd.f32 %v1320_v2, %v1307_v0 }
 0x21f   :  { %v1324_v5 = vmax.f32 %v1321_v3, 0.0 }
 0x221   :  { %v1325_v6 = vpack.c.bf16 %v1324_v5, %v1323_v4 }
 0x223   :  { %1402 = vmatmul.bf16.vlgmr.msra.gmra.mxu2 %v1325_v6 }
 0x2a6   :  { %v1403_v8 = vpop.f32.mrf.mxu2 }
 0x2a7   :  { %v1404_v9 = vadd.f32 %v2241_v7, %v1403_v8 }
 0x2a9   :  { %1408 = vmax.xlane.f32.xlu0 %v1404_v9 }
 0x2ae   :  { %v1405_v10 = vpop.f32.mrf.mxu2 }
 0x2af   :  { %v1406_v11 = vadd.f32 %v2241_v7, %v1405_v10 }
 0x2b1   :  { %1410 = vmax.xlane.f32.xlu0 %v1406_v11 }
 0x31c   :  { %v1409_v12 = vpop.xlane.xlu0 %1408 }
 0x31d   :  { %v1412_v13 = vsub.f32 %v1404_v9, %v1409_v12 }
 0x31f   :  { %v1414_v14 = vmul.f32 1.442695, %v1412_v13 }
 0x321   :  { %2242 = vpow2.f32 %v1414_v14 }
 0x324   :  { %v1411_v15 = vpop.xlane.xlu0 %1410 }
 0x325   :  { %v1413_v16 = vsub.f32 %v1406_v11, %v1411_v15 }
 0x327   :  { %v2243_v17 = vpop.eup %2242  ;;  %v1416_v18 = vmul.f32 1.442695, %v1413_v16 }
 0x328   :  { %1418 = vadd.xlane.f32.xlu1 %v2243_v17 }
 0x329   :  { %2244 = vpow2.f32 %v1416_v18 }
 0x32f   :  { %v2245_v19 = vpop.eup %2244 }
 0x330   :  { %1420 = vadd.xlane.f32.xlu1 %v2245_v19 }
 0x39b   :  { %v1419_v20 = vpop.xlane.xlu1 %1418 }
 0x39c   :  { %2246 = vrcp.f32 %v1419_v20 }
 0x3a2   :  { %v2247_v22 = vpop.eup %2246 }
 0x3a3   :  { %v1421_v21 = vpop.xlane.xlu1 %1420  ;;  %v1424_v25 = vmul.f32 %v2247_v22, %v2243_v17 }
 0x3a4   :  { %2248 = vrcp.f32 %v1421_v21 }
 0x3aa   :  { %v2249_v23 = vpop.eup %2248 }
 0x3ab   :  { %v1425_v24 = vmul.f32 %v2249_v23, %v2245_v19 }
 0x3ad   :  { %v2225_v26 = vpack.c.bf16 %v1425_v24, %v1424_v25 }
 0x3af   :  { %2226 = vst [vmem:[#allocation13] sm:$0xff] %v2225_v26  }
 0x3b0   :  { %1442 = dma.vmem_to_hbm [thread:$0]  %s1435_s8, 128, %s1437_s24, [#allocation4], %s2437_s16, %s2437_s16, %s2438_s17  }
 0x3b1   :  { %2426 = dma.done.wait [#allocation4], 128  }
 0x3b2   :  { %2427 = vsyncadd [#allocation4], 4294967168 }
 0x3b3   :  { %1447 = vsyncpa [#allocation3], 1 }
 0x3b4   :  { %1448 = vsyncpa [#allocation6], 1 }
 0x3b5   :  { %1449 = vsyncpa [#allocation9], 1 }
 0x3b6   :  { %1450 = vsyncpa [#allocation12], 1 }
 0x3b7   :  { %1451 = vsyncpa [#allocation4], 1 }

</bundles_post_ra>
